<compile_context>
chip_gen: v6e
topology: v6e:2x2x1
jax: 0.10.0
libtpu: 0.0.40
codegen_flags: <defaults>
</compile_context>

<pallas_src>
import functools

import jax
import jax.numpy as jnp
from jax.experimental import pallas as pl
from jax.experimental.pallas import tpu as pltpu


def _round_up(x, m):
    return ((x + m - 1) // m) * m


def _mlp_head_kernel(x_ref, w1_ref, b1_ref, w2_ref, b2_ref, w3_ref, b3_ref,
                     mu_ref):
    """Fused 3-layer MLP: (Linear+ReLU) x2 -> Linear.  bf16 MXU ops, f32 accum."""
    x = x_ref[...].astype(jnp.bfloat16)                         # cast in-kernel

    h1 = jnp.dot(x, w1_ref[...], preferred_element_type=jnp.float32)
    h1 = jnp.maximum(h1 + b1_ref[...], 0.0).astype(jnp.bfloat16)

    h2 = jnp.dot(h1, w2_ref[...], preferred_element_type=jnp.float32)
    h2 = jnp.maximum(h2 + b2_ref[...], 0.0).astype(jnp.bfloat16)

    mu = jnp.dot(h2, w3_ref[...], preferred_element_type=jnp.float32)
    mu = mu + b3_ref[...]                                        # (bb, Dout_pad)

    dout = mu_ref.shape[-1]                                      # real out features
    mu_ref[...] = mu[:, :dout].astype(mu_ref.dtype)              # compact store


@functools.partial(jax.jit, static_argnames=("block_b", "out_features"))
def _forward_impl(x, w1, b1, w2, b2, w3, b3, *, block_b, out_features):
    B, Din = x.shape
    H = w1.shape[1]
    Dout_pad = w3.shape[1]
    n_steps = pl.cdiv(B, block_b)

    flops = 2 * B * (Din * H + H * H + H * Dout_pad)
    bytes_accessed = (
        x.size * x.dtype.itemsize
        + w1.size * w1.dtype.itemsize + w2.size * w2.dtype.itemsize
        + w3.size * w3.dtype.itemsize
        + (b1.size + b2.size + b3.size) * 4
        + B * out_features * 4)

    def wspec(shape):
        # Grid-invariant (resident) operands: constant index_map.
        return pl.BlockSpec(shape, lambda i: (0, 0))

    return pl.pallas_call(
        _mlp_head_kernel,
        out_shape=jax.ShapeDtypeStruct((B, out_features), jnp.float32),
        grid_spec=pltpu.PrefetchScalarGridSpec(
            num_scalar_prefetch=0,
            grid=(n_steps,),
            in_specs=[
                pl.BlockSpec((block_b, Din), lambda i: (i, 0)),   # x tile (f32)
                wspec((Din, H)),                                  # w1 (bf16)
                wspec((1, H)),                                    # b1 (f32)
                wspec((H, H)),                                    # w2 (bf16)
                wspec((1, H)),                                    # b2 (f32)
                wspec((H, Dout_pad)),                             # w3 (bf16, lane-padded)
                wspec((1, Dout_pad)),                             # b3 (f32, lane-padded)
            ],
            out_specs=pl.BlockSpec((block_b, out_features), lambda i: (i, 0)),
        ),
        compiler_params=pltpu.CompilerParams(
            dimension_semantics=("parallel",)),
        cost_estimate=pl.CostEstimate(
            flops=flops, transcendentals=0, bytes_accessed=bytes_accessed),
    )(x, w1, b1, w2, b2, w3, b3)


def _choose_block_b(B):
    """Single big tile for small/medium B; even step count of ~2K-row tiles
    for large B (balances v7x's two TensorCores, amortizes per-step overhead)."""
    B8 = _round_up(B, 8)
    if B8 <= 1024:
        return B8
    n_steps = max(2, pl.cdiv(B8, 2048))
    if n_steps % 2:
        n_steps += 1
    return _round_up(pl.cdiv(B8, n_steps), 8)


def prepare_params(params):
    """One-time, off the per-call path: weights -> bf16 (MXU native); w3/b3
    lane-padded to a multiple of 128 (padded output columns are sliced off
    inside the kernel before the compact store); biases stay f32."""
    Dout = params["w3"].shape[1]
    Dout_pad = _round_up(max(Dout, 128), 128)
    return {
        "w1": params["w1"].astype(jnp.bfloat16),
        "b1": params["b1"].astype(jnp.float32),
        "w2": params["w2"].astype(jnp.bfloat16),
        "b2": params["b2"].astype(jnp.float32),
        "w3": jnp.pad(params["w3"],
                      ((0, 0), (0, Dout_pad - Dout))).astype(jnp.bfloat16),
        "b3": jnp.pad(params["b3"],
                      ((0, 0), (0, Dout_pad - Dout))).astype(jnp.float32),
        "out_features": Dout,
    }


def deterministic_head_forward(x, prepared_params, block_b=None):
    """mu = net(x)  (== dist.mean, i.e. forward(..., ret_action_value=True)).

    x: (B, input_size) float32
    prepared_params: output of prepare_params() (bf16 weights, f32 biases).
    """
    B = x.shape[0]
    if block_b is None:
        block_b = _choose_block_b(B)
    block_b = _round_up(block_b, 8)
    return _forward_impl(
        x,
        prepared_params["w1"], prepared_params["b1"],
        prepared_params["w2"], prepared_params["b2"],
        prepared_params["w3"], prepared_params["b3"],
        block_b=block_b,
        out_features=prepared_params["out_features"])


def init_params(key, input_size, output_size, hidden_size, num_layers=2):
    """Init mimicking nn.Linear: U(-1/sqrt(fan_in), 1/sqrt(fan_in)).
    Weights stored as (in_features, out_features), biases as (1, out_features)."""
    assert num_layers == 2, "kernel is fused for the default num_layers=2"
    sizes = [input_size] + [hidden_size] * num_layers + [output_size]
    params = {}
    names = [("w1", "b1"), ("w2", "b2"), ("w3", "b3")]
    for i, (wn, bn) in enumerate(names):
        fan_in, fan_out = sizes[i], sizes[i + 1]
        key, kw, kb = jax.random.split(key, 3)
        bound = 1.0 / jnp.sqrt(jnp.float32(fan_in))
        params[wn] = jax.random.uniform(
            kw, (fan_in, fan_out), jnp.float32, -bound, bound)
        params[bn] = jax.random.uniform(
            kb, (1, fan_out), jnp.float32, -bound, bound)
    return params


def _reference_forward(x, params):
    """Plain-JAX reference mirroring the kernel's bf16-operand / f32-accum math."""
    bf = lambda a: a.astype(jnp.bfloat16).astype(jnp.float32)
    h1 = jnp.maximum(bf(x) @ bf(params["w1"]) + params["b1"], 0.0)
    h2 = jnp.maximum(bf(h1) @ bf(params["w2"]) + params["b2"], 0.0)
    return bf(h2) @ bf(params["w3"]) + params["b3"]


# TODO(synk): the Normal/TruncatedNormal distribution object, log_prob-based
# loss_fn / pred_loss_fn are host-side training utilities with no kernel
# equivalent here; only the mu (= dist.mean) forward path is implemented.


if __name__ == "__main__":
    # Small shapes consistent with the module: x is (batch, input_size).
    batch, input_size, hidden_size, output_size = 8, 32, 128, 4

    key = jax.random.PRNGKey(0)
    key, kx = jax.random.split(key)
    x = jax.random.normal(kx, (batch, input_size), jnp.float32)
    raw_params = init_params(key, input_size, output_size, hidden_size)
    params = prepare_params(raw_params)          # one-time bf16 conversion

    mu = jax.block_until_ready(deterministic_head_forward(x, params))
    ref = _reference_forward(x, raw_params)
    assert mu.shape == (batch, output_size)
    assert jnp.allclose(mu, ref, atol=1e-2, rtol=1e-2), \
        float(jnp.max(jnp.abs(mu - ref)))

    # Second check: batch not divisible by the tile — exercises the partial
    # last block (grid = cdiv(B, block_b)) and the compact (B, Dout) output.
    key, kx2 = jax.random.split(key)
    x2 = jax.random.normal(kx2, (40, input_size), jnp.float32)
    mu2 = jax.block_until_ready(
        deterministic_head_forward(x2, params, block_b=16))
    ref2 = _reference_forward(x2, raw_params)
    assert mu2.shape == (40, output_size)
    assert jnp.allclose(mu2, ref2, atol=1e-2, rtol=1e-2), \
        float(jnp.max(jnp.abs(mu2 - ref2)))

    print("KERNEL_OK")
</pallas_src>

<mosaic_0001>
module attributes {stable_mosaic.version = 11 : i64} {
  func.func @_mlp_head_kernel(%arg0: i32, %arg1: memref<8x32xf32, #tpu.memory_space<vmem>>, %arg2: memref<32x128xbf16, #tpu.memory_space<vmem>>, %arg3: memref<1x128xf32, #tpu.memory_space<vmem>>, %arg4: memref<128x128xbf16, #tpu.memory_space<vmem>>, %arg5: memref<1x128xf32, #tpu.memory_space<vmem>>, %arg6: memref<128x128xbf16, #tpu.memory_space<vmem>>, %arg7: memref<1x128xf32, #tpu.memory_space<vmem>>, %arg8: memref<8x4xf32, #tpu.memory_space<vmem>>) attributes {dimension_semantics = [#tpu.dimension_semantics<parallel>], iteration_bounds = array<i64: 1>, scalar_prefetch = 0 : i64, scratch_operands = 0 : i64, tpu.core_type = #tpu.core_type<tc>, window_params = [{transform_indices = @transform_0, window_bounds = array<i64: 8, 32>}, {pipeline_mode = #tpu.pipeline_mode<synchronous>, transform_indices = @transform_1, window_bounds = array<i64: 32, 128>}, {pipeline_mode = #tpu.pipeline_mode<synchronous>, transform_indices = @transform_2, window_bounds = array<i64: 1, 128>}, {pipeline_mode = #tpu.pipeline_mode<synchronous>, transform_indices = @transform_3, window_bounds = array<i64: 128, 128>}, {pipeline_mode = #tpu.pipeline_mode<synchronous>, transform_indices = @transform_4, window_bounds = array<i64: 1, 128>}, {pipeline_mode = #tpu.pipeline_mode<synchronous>, transform_indices = @transform_5, window_bounds = array<i64: 128, 128>}, {pipeline_mode = #tpu.pipeline_mode<synchronous>, transform_indices = @transform_6, window_bounds = array<i64: 1, 128>}, {transform_indices = @transform_7, window_bounds = array<i64: 8, 4>}]} {
    %c0 = arith.constant 0 : index
    %c0_0 = arith.constant 0 : index
    %0 = vector.load %arg1[%c0, %c0_0] : memref<8x32xf32, #tpu.memory_space<vmem>>, vector<8x32xf32>
    %1 = arith.truncf %0 : vector<8x32xf32> to vector<8x32xbf16>
    %c0_1 = arith.constant 0 : index
    %c0_2 = arith.constant 0 : index
    %2 = vector.load %arg2[%c0_1, %c0_2] : memref<32x128xbf16, #tpu.memory_space<vmem>>, vector<32x128xbf16>
    %cst = arith.constant dense<0.000000e+00> : vector<8x128xf32>
    %3 = tpu.matmul %1, %2, %cst {dimension_numbers = #tpu.dot_dimension_numbers<[1], [0], [0], [1], [0, 0, 1, 1], [], []>} : vector<8x32xbf16>, vector<32x128xbf16>, vector<8x128xf32> -> vector<8x128xf32>
    %c0_3 = arith.constant 0 : index
    %c0_4 = arith.constant 0 : index
    %4 = vector.load %arg3[%c0_3, %c0_4] : memref<1x128xf32, #tpu.memory_space<vmem>>, vector<1x128xf32>
    %5 = vector.broadcast %4 : vector<1x128xf32> to vector<8x128xf32>
    %6 = arith.addf %3, %5 : vector<8x128xf32>
    %cst_5 = arith.constant 0.000000e+00 : f32
    %7 = vector.broadcast %cst_5 : f32 to vector<8x128xf32>
    %8 = arith.maximumf %6, %7 : vector<8x128xf32>
    %9 = arith.truncf %8 : vector<8x128xf32> to vector<8x128xbf16>
    %c0_6 = arith.constant 0 : index
    %c0_7 = arith.constant 0 : index
    %10 = vector.load %arg4[%c0_6, %c0_7] : memref<128x128xbf16, #tpu.memory_space<vmem>>, vector<128x128xbf16>
    %cst_8 = arith.constant dense<0.000000e+00> : vector<8x128xf32>
    %11 = tpu.matmul %9, %10, %cst_8 {dimension_numbers = #tpu.dot_dimension_numbers<[1], [0], [0], [1], [0, 0, 1, 1], [], []>} : vector<8x128xbf16>, vector<128x128xbf16>, vector<8x128xf32> -> vector<8x128xf32>
    %c0_9 = arith.constant 0 : index
    %c0_10 = arith.constant 0 : index
    %12 = vector.load %arg5[%c0_9, %c0_10] : memref<1x128xf32, #tpu.memory_space<vmem>>, vector<1x128xf32>
    %13 = vector.broadcast %12 : vector<1x128xf32> to vector<8x128xf32>
    %14 = arith.addf %11, %13 : vector<8x128xf32>
    %cst_11 = arith.constant 0.000000e+00 : f32
    %15 = vector.broadcast %cst_11 : f32 to vector<8x128xf32>
    %16 = arith.maximumf %14, %15 : vector<8x128xf32>
    %17 = arith.truncf %16 : vector<8x128xf32> to vector<8x128xbf16>
    %c0_12 = arith.constant 0 : index
    %c0_13 = arith.constant 0 : index
    %18 = vector.load %arg6[%c0_12, %c0_13] : memref<128x128xbf16, #tpu.memory_space<vmem>>, vector<128x128xbf16>
    %cst_14 = arith.constant dense<0.000000e+00> : vector<8x128xf32>
    %19 = tpu.matmul %17, %18, %cst_14 {dimension_numbers = #tpu.dot_dimension_numbers<[1], [0], [0], [1], [0, 0, 1, 1], [], []>} : vector<8x128xbf16>, vector<128x128xbf16>, vector<8x128xf32> -> vector<8x128xf32>
    %c0_15 = arith.constant 0 : index
    %c0_16 = arith.constant 0 : index
    %20 = vector.load %arg7[%c0_15, %c0_16] : memref<1x128xf32, #tpu.memory_space<vmem>>, vector<1x128xf32>
    %21 = vector.broadcast %20 : vector<1x128xf32> to vector<8x128xf32>
    %22 = arith.addf %19, %21 : vector<8x128xf32>
    %23 = vector.extract_strided_slice %22 {offsets = [0, 0], sizes = [8, 4], strides = [1, 1]} : vector<8x128xf32> to vector<8x4xf32>
    %c0_17 = arith.constant 0 : index
    %c0_18 = arith.constant 0 : index
    %24 = vector.load %arg8[%c0_17, %c0_18] : memref<8x4xf32, #tpu.memory_space<vmem>>, vector<8x4xf32>
    tpu.vector_store %arg8[%c0_17, %c0_18], %23 {strides = array<i32>} : memref<8x4xf32, #tpu.memory_space<vmem>>, vector<8x4xf32>,
    return
  }
  func.func @transform_0(%arg0: i32) -> (i32, i32) {
    %c0_i32 = arith.constant 0 : i32
    %c0_i32_0 = arith.constant 0 : i32
    return %arg0, %c0_i32 : i32, i32
  }
  func.func @transform_1(%arg0: i32) -> (i32, i32) {
    %c0_i32 = arith.constant 0 : i32
    %c0_i32_0 = arith.constant 0 : i32
    %c0_i32_1 = arith.constant 0 : i32
    return %c0_i32, %c0_i32_0 : i32, i32
  }
  func.func @transform_2(%arg0: i32) -> (i32, i32) {
    %c0_i32 = arith.constant 0 : i32
    %c0_i32_0 = arith.constant 0 : i32
    %c0_i32_1 = arith.constant 0 : i32
    return %c0_i32, %c0_i32_0 : i32, i32
  }
  func.func @transform_3(%arg0: i32) -> (i32, i32) {
    %c0_i32 = arith.constant 0 : i32
    %c0_i32_0 = arith.constant 0 : i32
    %c0_i32_1 = arith.constant 0 : i32
    return %c0_i32, %c0_i32_0 : i32, i32
  }
  func.func @transform_4(%arg0: i32) -> (i32, i32) {
    %c0_i32 = arith.constant 0 : i32
    %c0_i32_0 = arith.constant 0 : i32
    %c0_i32_1 = arith.constant 0 : i32
    return %c0_i32, %c0_i32_0 : i32, i32
  }
  func.func @transform_5(%arg0: i32) -> (i32, i32) {
    %c0_i32 = arith.constant 0 : i32
    %c0_i32_0 = arith.constant 0 : i32
    %c0_i32_1 = arith.constant 0 : i32
    return %c0_i32, %c0_i32_0 : i32, i32
  }
  func.func @transform_6(%arg0: i32) -> (i32, i32) {
    %c0_i32 = arith.constant 0 : i32
    %c0_i32_0 = arith.constant 0 : i32
    %c0_i32_1 = arith.constant 0 : i32
    return %c0_i32, %c0_i32_0 : i32, i32
  }
  func.func @transform_7(%arg0: i32) -> (i32, i32) {
    %c0_i32 = arith.constant 0 : i32
    %c0_i32_0 = arith.constant 0 : i32
    return %arg0, %c0_i32 : i32, i32
  }
}

</mosaic_0001>

<bundles_post_ra>
// kernel: _forward_impl.1
= control target key start
LH: loop header
LB: loop body
LE: loop exit
PB: predicated region body
PF: predicated region fallthrough
CT: control target
= control target key end

     0   :  { %12 = vsyncpa [#allocation3], 0  ;;  %s692_s0 = inlined_call_operand.hbm [shape: f32[8,32], index: 0, kind: input, shape index: {}]   ;;  %s693_s1 = inlined_call_operand.hbm [shape: bf16[32,128], index: 1, kind: input, shape index: {}]   ;;  %s694_s2 = inlined_call_operand.vmem [shape: f32[1,128], index: 2, kind: input, shape index: {}]   ;;  %s695_s3 = inlined_call_operand.hbm [shape: bf16[128,128], index: 3, kind: input, shape index: {}]   ;;  %s696_s4 = inlined_call_operand.vmem [shape: f32[1,128], index: 4, kind: input, shape index: {}]   ;;  %s697_s5 = inlined_call_operand.hbm [shape: bf16[128,128], index: 5, kind: input, shape index: {}]   ;;  %s698_s6 = inlined_call_operand.vmem [shape: f32[1,128], index: 6, kind: input, shape index: {}]   ;;  %s699_s7 = inlined_call_operand.vmem [shape: f32[8,4], index: 7, kind: output, shape index: {}]  }
   0x1   :  { %13 = vsyncpa [#allocation5], 0 }
   0x2   :  { %14 = vsyncpa [#allocation8], 0  ;;  %s587_s24 = smov [#allocation4]  }
   0x3   :  { %s30_s25 = sshll.u32 %s587_s24, 4  ;;  %s31_s25 = int_to_ptr.vmem [resolvable:$true] %s30_s25 }
   0x4   :  { %s509_s26 = scalar_lea.vmem %s31_s25, 256  ;;  %p514_p1 = scmp.lt.s32.totalorder %s31_s25, %s31_s25 }
   0x5   :  { %p510_p0 = scmp.ne.s32.totalorder %s31_s25, %s509_s26  ;;  %p515_p2 = scmp.lt.s32.totalorder %s509_s26, %s509_s26 }
   0x7   :  { %p516_p3 = por %p515_p2, %p514_p1 }
   0x9   :  { %p517_p4 = pnand %p516_p3, %p510_p0 }
   0xb   :  { %520 = shalt.err (!%p517_p4)
}
   0xc   :  { %s588_s27 = smov 64   ;;  %s589_s28 = smov 4  }
   0xd   :  { %36 = dma.hbm_to_vmem [thread:$0]  %s693_s1, 256, %s31_s25, [#allocation5], %s588_s27, %s588_s27, %s589_s28  }
   0xe   :  { %s590_s8 = smov [#allocation2]   ;;  %s591_s10 = smov [#allocation6]  }
   0xf   :  { %s21_s9 = sshll.u32 %s590_s8, 4  ;;  %s44_s11 = sshll.u32 %s591_s10, 4  ;;  %s22_s9 = int_to_ptr.vmem [resolvable:$true] %s21_s9  ;;  %s45_s11 = int_to_ptr.vmem [resolvable:$true] %s44_s11 }
  0x10   :  { %s529_s12 = scalar_lea.vmem %s22_s9, 128  ;;  %p534_p6 = scmp.lt.s32.totalorder %s22_s9, %s22_s9 }
  0x11   :  { %p530_p5 = scmp.ne.s32.totalorder %s22_s9, %s529_s12  ;;  %p535_p7 = scmp.lt.s32.totalorder %s529_s12, %s529_s12 }
  0x13   :  { %p536_p8 = por %p535_p7, %p534_p6 }
  0x15   :  { %p537_p9 = pnand %p536_p8, %p530_p5 }
  0x17   :  { %540 = shalt.err (!%p537_p9)
}
  0x18   :  { %24 = dma.hbm_to_vmem [thread:$0]  %s692_s0, 128, %s22_s9, [#allocation3]  }
  0x19   :  { %s549_s15 = scalar_lea.vmem %s45_s11, 1024  ;;  %p554_p11 = scmp.lt.s32.totalorder %s45_s11, %s45_s11 }
  0x1a   :  { %p550_p10 = scmp.ne.s32.totalorder %s45_s11, %s549_s15  ;;  %p555_p12 = scmp.lt.s32.totalorder %s549_s15, %s549_s15 }
  0x1c   :  { %p556_p13 = por %p555_p12, %p554_p11 }
  0x1e   :  { %p557_p0 = pnand %p556_p13, %p550_p10 }
  0x20   :  { %560 = shalt.err (!%p557_p0)
}
  0x21   :  { %50 = dma.hbm_to_vmem [thread:$0]  %s695_s3, 1024, %s45_s11, [#allocation5], %s588_s27, %s588_s27, %s589_s28  }
  0x22   :  { %s592_s17 = smov [#allocation7]  }
  0x23   :  { %s58_s18 = sshll.u32 %s592_s17, 4  ;;  %s59_s18 = int_to_ptr.vmem [resolvable:$true] %s58_s18 }
  0x24   :  { %s569_s19 = scalar_lea.vmem %s59_s18, 1024  ;;  %p574_p2 = scmp.lt.s32.totalorder %s59_s18, %s59_s18 }
  0x25   :  { %p570_p1 = scmp.ne.s32.totalorder %s59_s18, %s569_s19  ;;  %p575_p3 = scmp.lt.s32.totalorder %s569_s19, %s569_s19 }
  0x27   :  { %p576_p4 = por %p575_p3, %p574_p2 }
  0x29   :  { %p577_p5 = pnand %p576_p4, %p570_p1 }
  0x2b   :  { %580 = shalt.err (!%p577_p5)
}
  0x2c   :  { %64 = dma.hbm_to_vmem [thread:$0]  %s697_s5, 1024, %s59_s18, [#allocation8], %s588_s27, %s588_s27, %s589_s28  }
  0x2d   :  { %581 = dma.done.wait [#allocation3], 128  }
  0x2e   :  { %582 = vsyncadd [#allocation3], 4294967168 }
  0x2f   :  { %583 = dma.done.wait [#allocation5], 1280  }
  0x30   :  { %584 = vsyncadd [#allocation5], 4294966016 }
  0x31   :  { %585 = dma.done.wait [#allocation8], 1024  }
  0x32   :  { %586 = vsyncadd [#allocation8], 4294966272  ;;  %v593_v0 = vmov 0.0   ;;  %vm594_vm0 = vmmov 0   ;;  %v483_v1 = vld [vmem:[#allocation4 + $0x8] sm:$0xff]   ;;  %v484_v2 = vld [vmem:[#allocation4] sm:$0xff]  }
  0x33   :  { %427 = vmatprep.subr.bf16.mxu0 %v593_v0  ;;  %431 = vmatprep.mubr.msk.bf16.mxu0 %vm594_vm0, %v593_v0  ;;  %v80_v3 = vld [vmem:[#allocation2] sm:$0xff]  ;;  %v485_v4 = vld [vmem:[#allocation6 + $0x38] sm:$0xff]   ;;  %v486_v6 = vld [vmem:[#allocation6 + $0x30] sm:$0xff]   ;;  %vm105_vm1 = vcmask 261120   ;;  %vm375_vm2 = vcmask 31744  }
  0x34   :  { %435 = vmatprep.subr.bf16.mxu1 %v593_v0  ;;  %451 = vmatprep.mubr.msk.bf16.mxu1 %vm594_vm0, %v593_v0  ;;  %v81_v5 = vpack.c.bf16 %v80_v3, %v80_v3  ;;  %v487_v7 = vld [vmem:[#allocation6 + $0x28] sm:$0xff]   ;;  %v488_v8 = vld [vmem:[#allocation6 + $0x20] sm:$0xff]   ;;  %v489_v9 = vld [vmem:[#allocation6 + $0x18] sm:$0xff]  }
  0x35   :  { %428 = vmatpush3.bf16.msra.mxu0 %v483_v1  ;;  %436 = vmatpush3.bf16.msra.mxu1 %v485_v4  ;;  %v490_v10 = vld [vmem:[#allocation6 + $0x10] sm:$0xff]   ;;  %v491_v11 = vld [vmem:[#allocation6 + $0x8] sm:$0xff]   ;;  %v492_v12 = vld [vmem:[#allocation6] sm:$0xff]  }
  0x36   :  { %429 = vmatprep.subr.bf16.mxu0 %v593_v0  ;;  %437 = vmatprep.subr.bf16.mxu1 %v593_v0  ;;  %v493_v13 = vld [vmem:[#allocation7 + $0x38] sm:$0xff]   ;;  %v494_v14 = vld [vmem:[#allocation7 + $0x30] sm:$0xff]   ;;  %v495_v15 = vld [vmem:[#allocation7 + $0x28] sm:$0xff]  }
  0x37   :  { %v496_v16 = vld [vmem:[#allocation7 + $0x20] sm:$0xff]   ;;  %v497_v17 = vld [vmem:[#allocation7 + $0x18] sm:$0xff]   ;;  %v498_v18 = vld [vmem:[#allocation7 + $0x10] sm:$0xff]  }
  0x38   :  { %v384_v19 = vld [vmem:[%s694_s2] ss:$0 sm:$0xff]  ;;  %v500_v28 = vld [vmem:[#allocation7] sm:$0xff]  }
  0x39   :  { %430 = vmatpush3.bf16.msra.mxu0 %v484_v2  ;;  %438 = vmatpush3.bf16.msra.mxu1 %v486_v6  ;;  %v499_v27 = vld [vmem:[#allocation7 + $0x8] sm:$0xff]  }
  0x3a   :  { %455 = vmatprep.subr.bf16.mxu0 %v593_v0  ;;  %439 = vmatprep.subr.bf16.mxu1 %v593_v0  ;;  %v388_v29 = vld [vmem:[%s696_s4] ss:$0 sm:$0xff] }
  0x3b   :  { %v397_v37 = vld [vmem:[%s698_s6] ss:$0 sm:$0xff] }
  0x3c   :  { %432 = vmatmul.mubr.msk.bf16.vlgmr.msra.gmra.mxu0 %vm105_vm1, %v81_v5 }
  0x3d   :  { %471 = vmatprep.mubr.msk.bf16.mxu0 %vm594_vm0, %v593_v0  ;;  %440 = vmatpush3.bf16.msra.mxu1 %v487_v7 }
  0x3e   :  { %441 = vmatprep.subr.bf16.mxu1 %v593_v0  ;;  %456 = vmatpush3.bf16.msra.mxu0 %v493_v13 }
  0x3f   :  { %457 = vmatprep.subr.bf16.mxu0 %v593_v0 }
  0x41   :  { %442 = vmatpush3.bf16.msra.mxu1 %v488_v8 }
  0x42   :  { %443 = vmatprep.subr.bf16.mxu1 %v593_v0  ;;  %458 = vmatpush3.bf16.msra.mxu0 %v494_v14 }
  0x43   :  { %459 = vmatprep.subr.bf16.mxu0 %v593_v0 }
  0x45   :  { %444 = vmatpush3.bf16.msra.mxu1 %v489_v9 }
  0x46   :  { %445 = vmatprep.subr.bf16.mxu1 %v593_v0  ;;  %460 = vmatpush3.bf16.msra.mxu0 %v495_v15 }
  0x47   :  { %461 = vmatprep.subr.bf16.mxu0 %v593_v0 }
  0x49   :  { %446 = vmatpush3.bf16.msra.mxu1 %v490_v10 }
  0x4a   :  { %447 = vmatprep.subr.bf16.mxu1 %v593_v0  ;;  %462 = vmatpush3.bf16.msra.mxu0 %v496_v16 }
  0x4b   :  { %463 = vmatprep.subr.bf16.mxu0 %v593_v0 }
  0x4d   :  { %448 = vmatpush3.bf16.msra.mxu1 %v491_v11 }
  0x4e   :  { %449 = vmatprep.subr.bf16.mxu1 %v593_v0  ;;  %464 = vmatpush3.bf16.msra.mxu0 %v497_v17 }
  0x4f   :  { %465 = vmatprep.subr.bf16.mxu0 %v593_v0 }
  0x51   :  { %450 = vmatpush3.bf16.msra.mxu1 %v492_v12 }
  0x52   :  { %466 = vmatpush3.bf16.msra.mxu0 %v498_v18 }
  0x53   :  { %467 = vmatprep.subr.bf16.mxu0 %v593_v0 }
  0x56   :  { %468 = vmatpush3.bf16.msra.mxu0 %v499_v27 }
  0x57   :  { %469 = vmatprep.subr.bf16.mxu0 %v593_v0 }
  0x5a   :  { %470 = vmatpush3.bf16.msra.mxu0 %v500_v28 }
  0xfc   :  { %v143_v20 = vpop.f32.mrf.mxu0 }
  0xfd   :  { %v144_v21 = vadd.f32 %v384_v19, %v143_v20 }
  0xfe   :  { %v433_v22 = vpop.f32.mrf.mxu0 }
  0xff   :  { %v149_v23 = vmax.f32 %v144_v21, 0.0 }
 0x100   :  { %v146_v24 = vpop.f32.mrf.mxu0 }
 0x101   :  { %v150_v25 = vpack.c.bf16 %v149_v23, %v149_v23 }
 0x102   :  { %v434_v26 = vpop.f32.mrf.mxu0 }
 0x103   :  { %452 = vmatmul.mubr.bf16.vlgmr.msra.gmra.mxu1 %v150_v25 }
 0x1c3   :  { %v256_v30 = vpop.f32.mrf.mxu1 }
 0x1c4   :  { %v257_v31 = vadd.f32 %v388_v29, %v256_v30 }
 0x1c5   :  { %v453_v32 = vpop.f32.mrf.mxu1 }
 0x1c6   :  { %v262_v33 = vmax.f32 %v257_v31, 0.0 }
 0x1c7   :  { %v259_v34 = vpop.f32.mrf.mxu1 }
 0x1c8   :  { %v263_v35 = vpack.c.bf16 %v262_v33, %v262_v33 }
 0x1c9   :  { %v454_v36 = vpop.f32.mrf.mxu1 }
 0x1ca   :  { %472 = vmatmul.mubr.bf16.vlgmr.msra.gmra.mxu0 %v263_v35 }
 0x28a   :  { %v369_v38 = vpop.f32.mrf.mxu0 }
 0x28b   :  { %v370_v39 = vadd.f32 %v397_v37, %v369_v38 }
 0x28c   :  { %v473_v40 = vpop.f32.mrf.mxu0 }
 0x28d   :  { %376 = vst.msk [vmem:[%s699_s7] sm:$0xff] %vm375_vm2, %v370_v39 }
 0x28e   :  { %v372_v41 = vpop.f32.mrf.mxu0 }
 0x290   :  { %v474_v42 = vpop.f32.mrf.mxu0 }
 0x291   :  { %381 = vsyncpa [#allocation3], 1 }
 0x292   :  { %382 = vsyncpa [#allocation5], 1 }
 0x293   :  { %383 = vsyncpa [#allocation8], 1 }

</bundles_post_ra>
